<compile_context>
chip_gen: v7x
topology: tpu7x:2x2x1
jax: 0.10.0
libtpu: 0.0.40
codegen_flags: <defaults>
</compile_context>

<pallas_src>
import functools
import math

import jax
import jax.numpy as jnp
from jax.experimental import pallas as pl
from jax.experimental.pallas import tpu as pltpu


def _wscale_kernel(scale, x_ref, b_ref, o_ref):
    # out = x * scale + bias ; bias block is (Bp, 1) (4-D path, per-row bias) or
    # (1, Cw) (2-D path, per-column bias) and broadcasts against the (Bp, Cw) tile.
    o_ref[...] = x_ref[...] * scale + b_ref[...]


def _choose_tiles(rows, cols, itemsize, target_bytes=2 * 1024 * 1024):
    """Pick a (Bp, Cw) tile: lane dim multiple of 128 (or full), sublane multiple of 8."""
    # Lane (last) dim: full width if it fits the target budget, else a multiple of 128.
    if cols * itemsize <= target_bytes or cols <= 128:
        cw = cols
    else:
        cw = min(cols // 128 * 128, max(128, (target_bytes // itemsize) // 128 * 128))
    # Sublane (second-last) dim: multiple of 8, or the full dim when rows < 8.
    if rows <= 8:
        bp = rows
    else:
        cap = max(8, (target_bytes // max(cw * itemsize, 1)) // 8 * 8)
        bp = max(8, min(rows // 8 * 8, cap))
        # Keep at least two grid steps so both v7x TensorCores get work.
        if bp >= rows and rows > 8:
            bp = max(8, (rows // 2) // 8 * 8)
    return bp, cw


def _wscale_2d(x2, b2, scale, *, bias_along_rows):
    rows, cols = x2.shape
    itemsize = x2.dtype.itemsize
    bp, cw = _choose_tiles(rows, cols, itemsize)
    grid = (pl.cdiv(rows, bp), pl.cdiv(cols, cw))

    if bias_along_rows:           # b2: (rows, 1) column of per-row biases
        b_spec = pl.BlockSpec((bp, 1), lambda i, j: (i, 0))
    else:                         # b2: (1, cols) row of per-column biases
        b_spec = pl.BlockSpec((1, cw), lambda i, j: (0, j))

    kernel = functools.partial(_wscale_kernel, scale)
    bytes_accessed = (2 * rows * cols + b2.size) * itemsize

    return pl.pallas_call(
        kernel,
        out_shape=jax.ShapeDtypeStruct((rows, cols), x2.dtype),
        grid_spec=pltpu.PrefetchScalarGridSpec(
            num_scalar_prefetch=0,
            grid=grid,
            in_specs=[
                pl.BlockSpec((bp, cw), lambda i, j: (i, j)),
                b_spec,
            ],
            out_specs=pl.BlockSpec((bp, cw), lambda i, j: (i, j)),
        ),
        compiler_params=pltpu.CompilerParams(
            dimension_semantics=("parallel", "parallel"),
            vmem_limit_bytes=32 * 1024 * 1024,
        ),
        cost_estimate=pl.CostEstimate(
            flops=2 * rows * cols,
            transcendentals=0,
            bytes_accessed=bytes_accessed,
        ),
    )(x2, b2)


def wscale_layer(x, bias, *, in_channels, kernel_size,
                 gain=math.sqrt(2.0), lr_multiplier=1.0):
    """JAX/Pallas equivalent of WScaleLayer.forward."""
    fan_in = in_channels * kernel_size * kernel_size
    scale = float(gain / math.sqrt(fan_in) * lr_multiplier)

    if x.ndim == 4:
        n, c, h, w = x.shape
        rows, cols = n * c, h * w
        x2 = x.reshape(rows, cols)
        # Per-row bias column: row index n*C + c gets bias[c] * lr_multiplier.
        b2 = jnp.tile(bias.astype(x.dtype) * lr_multiplier, n).reshape(rows, 1)
        out2 = _wscale_2d(x2, b2, scale, bias_along_rows=True)
        return out2.reshape(n, c, h, w)
    elif x.ndim == 2:
        rows, cols = x.shape
        b2 = (bias.astype(x.dtype) * lr_multiplier).reshape(1, cols)
        return _wscale_2d(x, b2, scale, bias_along_rows=False)
    else:
        raise ValueError(
            f'The input tensor should be with shape [batch_size, num_channels, '
            f'height, width], or [batch_size, num_channels], but {x.shape} received!')


if __name__ == "__main__":
    key = jax.random.PRNGKey(0)
    k1, k2, k3, k4 = jax.random.split(key, 4)

    gain = math.sqrt(2.0)
    lr_multiplier = 1.0

    # 4-D (conv activation) path: x is [N, out_channels, H, W].
    in_channels, out_channels, kernel_size = 4, 4, 3
    scale4 = gain / math.sqrt(in_channels * kernel_size * kernel_size) * lr_multiplier
    x4 = jax.random.normal(k1, (2, out_channels, 16, 16), dtype=jnp.float32)
    bias4 = jax.random.normal(k2, (out_channels,), dtype=jnp.float32)

    y4 = wscale_layer(x4, bias4, in_channels=in_channels, kernel_size=kernel_size,
                      gain=gain, lr_multiplier=lr_multiplier)
    y4 = jax.block_until_ready(y4)
    ref4 = x4 * scale4 + bias4.reshape(1, -1, 1, 1) * lr_multiplier
    assert y4.shape == x4.shape and y4.dtype == x4.dtype
    assert jnp.allclose(y4, ref4, atol=1e-6), "4D mismatch vs reference"

    # 2-D (fully-connected) path: x is [batch, out_features].
    fc_in, fc_out = 32, 32
    scale2 = gain / math.sqrt(fc_in * 1 * 1) * lr_multiplier
    x2 = jax.random.normal(k3, (2, fc_out), dtype=jnp.float32)
    bias2 = jax.random.normal(k4, (fc_out,), dtype=jnp.float32)

    y2 = wscale_layer(x2, bias2, in_channels=fc_in, kernel_size=1,
                      gain=gain, lr_multiplier=lr_multiplier)
    y2 = jax.block_until_ready(y2)
    ref2 = x2 * scale2 + bias2.reshape(1, -1) * lr_multiplier
    assert y2.shape == x2.shape and y2.dtype == x2.dtype
    assert jnp.allclose(y2, ref2, atol=1e-6), "2D mismatch vs reference"

    print("KERNEL_OK")
</pallas_src>

<mosaic_0001>
module attributes {stable_mosaic.version = 11 : i64} {
  func.func @_wscale_kernel(%arg0: i32, %arg1: i32, %arg2: memref<8x256xf32, #tpu.memory_space<vmem>>, %arg3: memref<8x1xf32, #tpu.memory_space<vmem>>, %arg4: memref<8x256xf32, #tpu.memory_space<vmem>>) attributes {dimension_semantics = [#tpu.dimension_semantics<parallel>, #tpu.dimension_semantics<parallel>], iteration_bounds = array<i64: 1, 1>, scalar_prefetch = 0 : i64, scratch_operands = 0 : i64, tpu.core_type = #tpu.core_type<tc>, window_params = [{transform_indices = @transform_0, window_bounds = array<i64: 8, 256>}, {transform_indices = @transform_1, window_bounds = array<i64: 8, 1>}, {transform_indices = @transform_2, window_bounds = array<i64: 8, 256>}]} {
    %c0 = arith.constant 0 : index
    %c0_0 = arith.constant 0 : index
    %0 = vector.load %arg2[%c0, %c0_0] : memref<8x256xf32, #tpu.memory_space<vmem>>, vector<8x256xf32>
    %cst = arith.constant 0.235702261 : f32
    %1 = vector.broadcast %cst : f32 to vector<8x256xf32>
    %2 = arith.mulf %0, %1 : vector<8x256xf32>
    %c0_1 = arith.constant 0 : index
    %c0_2 = arith.constant 0 : index
    %3 = vector.load %arg3[%c0_1, %c0_2] : memref<8x1xf32, #tpu.memory_space<vmem>>, vector<8x1xf32>
    %4 = vector.broadcast %3 : vector<8x1xf32> to vector<8x256xf32>
    %5 = arith.addf %2, %4 : vector<8x256xf32>
    %c0_3 = arith.constant 0 : index
    %c0_4 = arith.constant 0 : index
    %6 = vector.load %arg4[%c0_3, %c0_4] : memref<8x256xf32, #tpu.memory_space<vmem>>, vector<8x256xf32>
    tpu.vector_store %arg4[%c0_3, %c0_4], %5 {strides = array<i32>} : memref<8x256xf32, #tpu.memory_space<vmem>>, vector<8x256xf32>,
    return
  }
  func.func @transform_0(%arg0: i32, %arg1: i32) -> (i32, i32) {
    %c0_i32 = arith.constant 0 : i32
    return %arg0, %arg1 : i32, i32
  }
  func.func @transform_1(%arg0: i32, %arg1: i32) -> (i32, i32) {
    %c0_i32 = arith.constant 0 : i32
    %c0_i32_0 = arith.constant 0 : i32
    return %arg0, %c0_i32 : i32, i32
  }
  func.func @transform_2(%arg0: i32, %arg1: i32) -> (i32, i32) {
    %c0_i32 = arith.constant 0 : i32
    return %arg0, %arg1 : i32, i32
  }
}

</mosaic_0001>

<bundles_post_ra>
// kernel: tpu_custom_call.1
= control target key start
LH: loop header
LB: loop body
LE: loop exit
PB: predicated region body
PF: predicated region fallthrough
CT: control target
= control target key end

     0   :  { %7 = vsyncpa [#allocation3], 0  ;;  %s150_s0 = inlined_call_operand.hbm [shape: f32[8,256], index: 0, kind: input, shape index: {}]   ;;  %s151_s1 = inlined_call_operand.vmem [shape: f32[8,1], index: 1, kind: input, shape index: {}]   ;;  %s152_s2 = inlined_call_operand.hbm [shape: f32[8,256], index: 2, kind: output, shape index: {}]  }
   0x1   :  { %8 = vsyncpa [#allocation4], 0  ;;  %s105_s9 = smov [#allocation2]   ;;  %s57_s13 = scalar_lea.hbm %s150_s0, 256 }
   0x2   :  { %s15_s10 = sshll.u32 %s105_s9, 4  ;;  %p58_p0 = scmp.ne.s32.totalorder %s150_s0, %s57_s13  ;;  %s16_s10 = int_to_ptr.vmem [resolvable:$true] %s15_s10 }
   0x3   :  { %p61_p1 = scmp.lt.u32.totalorder %s57_s13, %s150_s0 }
   0x5   :  { %p63_p2 = pnand %p61_p1, %p58_p0 }
   0x7   :  { %66 = shalt.err (!%p63_p2)
}
   0x8   :  { %s67_s18 = scalar_lea.vmem %s16_s10, 256  ;;  %p72_p4 = scmp.lt.s32.totalorder %s16_s10, %s16_s10 }
   0x9   :  { %p68_p3 = scmp.ne.s32.totalorder %s16_s10, %s67_s18  ;;  %p73_p5 = scmp.lt.s32.totalorder %s67_s18, %s67_s18 }
   0xb   :  { %p74_p6 = por %p73_p5, %p72_p4 }
   0xd   :  { %p75_p7 = pnand %p74_p6, %p68_p3 }
   0xf   :  { %78 = shalt.err (!%p75_p7)
}
  0x10   :  { %18 = dma.hbm_to_vmem [thread:$0]  %s150_s0, 256, %s16_s10, [#allocation3]  }
  0x11   :  { %101 = dma.done.wait [#allocation3], 256  }
  0x12   :  { %102 = vsyncadd [#allocation3], 4294967040  ;;  %v106_v0 = vmov 0   ;;  %v28_v1 = vld [vmem:[%s151_s1] sm:$0xff]  ;;  %v25_v3 = vld [vmem:[#allocation2 + $0x8] sm:$0xff]  ;;  %s107_s23 = smov [#allocation5]  }
  0x13   :  { %56 = vset.pattern.permute.xlu0 %v106_v0  ;;  %v24_v2 = vld [vmem:[#allocation2] sm:$0xff]  ;;  %v27_v5 = vmul.f32 0.23570226, %v25_v3  ;;  %s44_s24 = sshll.u32 %s107_s23, 4  ;;  %s45_s24 = int_to_ptr.vmem [resolvable:$true] %s44_s24 }
  0x14   :  { %31 = vperm.xlu0 %56, %v28_v1   ;;  %v26_v4 = vmul.f32 0.23570226, %v24_v2  ;;  %s79_s0 = scalar_lea.vmem %s45_s24, 256  ;;  %p84_p9 = scmp.lt.s32.totalorder %s45_s24, %s45_s24 }
  0x15   :  { %p80_p8 = scmp.ne.s32.totalorder %s45_s24, %s79_s0  ;;  %p85_p10 = scmp.lt.s32.totalorder %s79_s0, %s79_s0 }
  0x17   :  { %p86_p11 = por %p85_p10, %p84_p9 }
  0x19   :  { %p87_p12 = pnand %p86_p11, %p80_p8 }
  0x93   :  { %v32_v6 = vpop.permute.xlu0 %31 }
  0x94   :  { %v34_v7 = vadd.f32 %v32_v6, %v26_v4  ;;  %v35_v8 = vadd.f32 %v32_v6, %v27_v5 }
  0x96   :  { %36 = vst [vmem:[#allocation5] sm:$0xff] %v34_v7  ;;  %37 = vst [vmem:[#allocation5 + $0x8] sm:$0xff] %v35_v8 }
  0x97   :  { %90 = shalt.err (!%p87_p12)
}
  0x98   :  { %s91_s26 = scalar_lea.hbm %s152_s2, 256 }
  0x99   :  { %p92_p13 = scmp.ne.s32.totalorder %s152_s2, %s91_s26  ;;  %p95_p0 = scmp.lt.u32.totalorder %s91_s26, %s152_s2 }
  0x9b   :  { %p97_p1 = pnand %p95_p0, %p92_p13 }
  0x9d   :  { %100 = shalt.err (!%p97_p1)
}
  0x9e   :  { %47 = dma.vmem_to_hbm [thread:$0]  %s45_s24, 256, %s152_s2, [#allocation4]  }
  0x9f   :  { %103 = dma.done.wait [#allocation4], 256  }
  0xa0   :  { %104 = vsyncadd [#allocation4], 4294967040 }
  0xa1   :  { %51 = vsyncpa [#allocation3], 1 }
  0xa2   :  { %52 = vsyncpa [#allocation4], 1 }

</bundles_post_ra>
